<compile_context>
chip_gen: v6e
topology: v6e:2x2x1
jax: 0.10.0
libtpu: 0.0.40
codegen_flags: <defaults>
</compile_context>

<pallas_src>
import functools

import jax
import jax.numpy as jnp
from jax.experimental import pallas as pl
from jax.experimental.pallas import tpu as pltpu


def _round_up(x, m):
    return (x + m - 1) // m * m


def rnn_chunk_kernel(y0_ref, x_ref, w_in_ref, w_h_ref, b1_ref, w_o_ref, b2_ref,
                     logp_ref, hid_out_ref, y_sc, *,
                     hidden_size, chunk, seq_len):
    c = pl.program_id(0)

    # Initialize the carried state once (scratch persists across grid steps).
    @pl.when(c == 0)
    def _():
        y_sc[...] = y0_ref[...]

    dot = lambda a, b: jnp.dot(a, b, preferred_element_type=jnp.float32)

    # Weights are VMEM-resident (constant index_map); load once per chunk.
    w_in = w_in_ref[...]      # (n_inp, H+O)  bf16
    w_h = w_h_ref[...]        # (H+O,  H+O)   bf16 (rows >= H are zero)
    b1 = b1_ref[...]          # (B_pad, H+O)  f32  (category folded in)
    w_o = w_o_ref[...]        # (H+O, O_pad)  bf16
    b2 = b2_ref[...]          # (1, O_pad)    f32  (-1e30 on padded lanes)

    exact = (seq_len % chunk) == 0          # static: no time padding needed?

    y = y_sc[...]                           # (B_pad, H+O) f32 carry == prev y1
    # Fully-unrolled chunk body: static indices for the streamed loads/stores,
    # straight-line code for the scheduler (equiv. to fori_loop(unroll=True)).
    for i in range(chunk):
        x = x_ref[i]                                            # (B_pad, n_inp) bf16

        # Layer 1, fused [in2h | in2o] with category pre-folded into b1:
        #   y_new == cat(h_new, out1).  Zero rows of w_h mean only y[:, :H]
        #   (the previous hidden) contributes -> no slice on the critical path.
        y_new = dot(x, w_in) + dot(y.astype(w_h.dtype), w_h) + b1      # f32

        # Layer 2 (o2o) consumes the unsplit y_new; output lanes padded to 128.
        out2 = dot(y_new.astype(w_o.dtype), w_o) + b2                  # (B_pad, O_pad) f32

        # Dropout(p=0.1): identity in eval mode.
        # TODO(synk): training-mode dropout (stochastic masking) not implemented.

        # log_softmax in f32; padded columns carry a -1e30 bias -> exp(.) == 0,
        # so the real columns are unaffected.
        m = jnp.max(out2, axis=-1, keepdims=True)
        s = out2 - m
        lse = jnp.log(jnp.sum(jnp.exp(s), axis=-1, keepdims=True))
        logp_ref[i] = (s - lse).astype(logp_ref.dtype)                 # lane-dense store

        if exact:
            y = y_new
        else:
            # Don't advance the carry past the true sequence end (time padding).
            y = jnp.where(c * chunk + i < seq_len, y_new, y)

    y_sc[...] = y

    @pl.when(c == pl.num_programs(0) - 1)
    def _():
        hid_out_ref[...] = y[:, :hidden_size]   # one-time lane slice at the end


@functools.partial(jax.jit,
                   static_argnames=("compute_dtype", "out_dtype", "time_chunk"))
def rnn_forward_seq(category, inputs_seq, hidden0, params,
                    compute_dtype=jnp.bfloat16, out_dtype=jnp.float32,
                    time_chunk=32):
    """Run T recurrent steps in one kernel (time axis chunked by `time_chunk`).

    category:   (B, n_categories)     - constant over the sequence
    inputs_seq: (T, B, input_size)    - one input per step
    hidden0:    (B, hidden_size)
    returns:    (logp (T, B, output_size), final_hidden (B, hidden_size))
    """
    T, B, n_inp = inputs_seq.shape
    n_cat = category.shape[-1]
    H = hidden0.shape[-1]
    O = params["b_o2o"].shape[-1]
    HO = H + O

    B_pad = _round_up(max(B, 8), 8)          # fill sublanes / MXU rows
    O_pad = _round_up(max(O, 128), 128)      # lane-dense output stores

    Tc = max(1, min(time_chunk, T))          # small T -> single grid step
    T_pad = _round_up(T, Tc)
    n_chunks = T_pad // Tc

    # Streamed per-step inputs only (time- and batch-padded, MXU dtype).
    x = jnp.pad(inputs_seq,
                ((0, T_pad - T), (0, B_pad - B), (0, 0))).astype(compute_dtype)

    # Fold the constant category term into a per-row layer-1 bias (f32, once).
    w_cat = params["w_ci"][:n_cat].astype(jnp.float32)                 # (n_cat, H+O)
    cat_pad = jnp.pad(category, ((0, B_pad - B), (0, 0))).astype(jnp.float32)
    b1_eff = params["b1"].astype(jnp.float32) + cat_pad @ w_cat        # (B_pad, H+O)

    w_in = params["w_ci"][n_cat:].astype(compute_dtype)                # (n_inp, H+O)
    # Recurrent weight padded with zero rows so the carry can be the full y1.
    w_h = jnp.pad(params["w_h"], ((0, O), (0, 0))).astype(compute_dtype)   # (H+O, H+O)

    # Pad o2o output columns: zero weights, -1e30 bias -> ignored by log_softmax.
    w_o = jnp.pad(params["w_o2o"],
                  ((0, 0), (0, O_pad - O))).astype(compute_dtype)      # (H+O, O_pad)
    b2 = jnp.pad(params["b_o2o"].astype(jnp.float32),
                 ((0, 0), (0, O_pad - O)), constant_values=-1e30)      # (1, O_pad)

    # Initial carry: y0[:, :H] = hidden0, tail ignored (zero rows in w_h).
    y0 = jnp.pad(hidden0.astype(jnp.float32), ((0, B_pad - B), (0, O)))  # (B_pad, H+O)

    def resident(shape):
        # Same block every grid step -> stays in VMEM, DMA'd once.
        return pl.BlockSpec(shape, lambda c: (0,) * len(shape))

    kernel = functools.partial(rnn_chunk_kernel,
                               hidden_size=H, chunk=Tc, seq_len=T)

    # VMEM footprint is tiny (<100 KB incl. double buffering); no explicit
    # vmem_limit_bytes needed.  If H/O/Tc grow, re-derive the chunk size against
    # v7x's 64 MiB physical / 32 MiB default scoped VMEM.
    logp_all, hid_out = pl.pallas_call(
        kernel,
        out_shape=(jax.ShapeDtypeStruct((T_pad, B_pad, O_pad), out_dtype),
                   jax.ShapeDtypeStruct((B_pad, H), jnp.float32)),
        grid_spec=pltpu.PrefetchScalarGridSpec(
            num_scalar_prefetch=0,
            grid=(n_chunks,),
            in_specs=[
                resident((B_pad, HO)),                                   # y0 (initial carry)
                pl.BlockSpec((Tc, B_pad, n_inp), lambda c: (c, 0, 0)),   # input chunk
                resident((n_inp, HO)),                                   # w_in
                resident((HO, HO)),                                      # w_h (zero-row padded)
                resident((B_pad, HO)),                                   # b1_eff (incl. category)
                resident((HO, O_pad)),                                   # w_o2o (lane padded)
                resident((1, O_pad)),                                    # b2   (lane padded)
            ],
            out_specs=(
                pl.BlockSpec((Tc, B_pad, O_pad), lambda c: (c, 0, 0)),   # logp chunk
                resident((B_pad, H)),                                    # final hidden
            ),
            scratch_shapes=[pltpu.VMEM((B_pad, HO), jnp.float32)],       # carried y1
        ),
        # Time-chunk axis is a recurrence -> "arbitrary".  (For v7x with larger
        # batches, add a leading batch-tile axis marked "parallel" to feed the
        # second TensorCore; pointless at B=2.)
        compiler_params=pltpu.CompilerParams(
            dimension_semantics=("arbitrary",)),
    )(y0, x, w_in, w_h, b1_eff, w_o, b2)

    return logp_all[:T, :B, :O], hid_out[:B]


def rnn_forward(category, inputs, hidden, params, compute_dtype=jnp.bfloat16):
    """Single-step API matching the PyTorch module's forward(category, input, hidden)."""
    logp, h_new = rnn_forward_seq(category, inputs[None], hidden, params,
                                  compute_dtype=compute_dtype)
    return logp[0], h_new


def init_params(key, n_categories, input_size, hidden_size, output_size):
    """PyTorch-Linear-style init, stored pre-fused: W1 = [w_in2h | w_in2o]."""
    def linear(key, fan_in, fan_out):
        kw, kb = jax.random.split(key)
        bound = 1.0 / jnp.sqrt(jnp.float32(fan_in))
        w = jax.random.uniform(kw, (fan_in, fan_out), jnp.float32, -bound, bound)
        b = jax.random.uniform(kb, (1, fan_out), jnp.float32, -bound, bound)
        return w, b

    k1, k2, k3 = jax.random.split(key, 3)
    comb = n_categories + input_size + hidden_size

    w_in2h, b_in2h = linear(k1, comb, hidden_size)               # (comb, H), (1, H)
    w_in2o, b_in2o = linear(k2, comb, output_size)               # (comb, O), (1, O)
    w_o2o, b_o2o = linear(k3, hidden_size + output_size, output_size)

    n_ci = n_categories + input_size
    w1 = jnp.concatenate([w_in2h, w_in2o], axis=1)               # (comb, H+O)
    return {
        "w_ci": w1[:n_ci],                                       # (nc+ni, H+O)
        "w_h": w1[n_ci:],                                        # (H,     H+O)
        "b1": jnp.concatenate([b_in2h, b_in2o], axis=1),         # (1,     H+O)
        "w_o2o": w_o2o,                                          # (H+O, O)
        "b_o2o": b_o2o,                                          # (1, O)
    }


def rnn_forward_seq_ref(category, inputs_seq, hidden0, params,
                        compute_dtype=jnp.float32):
    """Pure-JAX reference (same math / dtype handling) for correctness checks."""
    H = hidden0.shape[-1]
    n_cat = category.shape[-1]

    w_cat = params["w_ci"][:n_cat].astype(jnp.float32)
    b1_eff = params["b1"].astype(jnp.float32) + category.astype(jnp.float32) @ w_cat
    w_in = params["w_ci"][n_cat:].astype(compute_dtype)
    w_h = params["w_h"].astype(compute_dtype)
    w_o = params["w_o2o"].astype(compute_dtype)
    b2 = params["b_o2o"].astype(jnp.float32)

    dot = functools.partial(jnp.dot, preferred_element_type=jnp.float32,
                            precision=jax.lax.Precision.HIGHEST)

    def step(h, x):
        y1 = (dot(x.astype(compute_dtype), w_in)
              + dot(h.astype(compute_dtype), w_h) + b1_eff)
        h_new = y1[:, :H]
        out2 = dot(y1.astype(compute_dtype), w_o) + b2
        logp = jax.nn.log_softmax(out2, axis=-1)
        return h_new, logp

    h_final, logps = jax.lax.scan(step, hidden0.astype(jnp.float32), inputs_seq)
    return logps, h_final


if __name__ == "__main__":
    # Small shapes consistent with the module's forward.
    # (n_categories is 0 in the original script; we pick 4 so `category` is
    #  non-degenerate — the kernel works for any n_categories >= 0.)
    batch = 2
    seq_len = 8
    n_categories = 4
    input_size = 16
    hidden_size = 32
    output_size = 24

    key = jax.random.PRNGKey(0)
    k_cat, k_in, k_par = jax.random.split(key, 3)

    category = jax.random.normal(k_cat, (batch, n_categories), jnp.float32)
    inputs_seq = jax.random.normal(k_in, (seq_len, batch, input_size), jnp.float32)
    hidden0 = jnp.zeros((batch, hidden_size), jnp.float32)       # initHidden()

    params = init_params(k_par, n_categories, input_size, hidden_size, output_size)

    logp, hid = rnn_forward_seq(category, inputs_seq, hidden0, params)
    jax.block_until_ready((logp, hid))

    assert logp.shape == (seq_len, batch, output_size)
    assert hid.shape == (batch, hidden_size)

    # Matched-precision reference (bf16 MXU operands, f32 accumulation/softmax).
    logp_ref, hid_ref = rnn_forward_seq_ref(category, inputs_seq, hidden0, params,
                                            compute_dtype=jnp.bfloat16)
    assert jnp.allclose(logp, logp_ref, atol=2e-3, rtol=2e-3)
    assert jnp.allclose(hid, hid_ref, atol=2e-3, rtol=2e-3)

    # Full-f32 (PyTorch-semantics) reference; loose tolerance covers bf16 rounding.
    logp_f32, hid_f32 = rnn_forward_seq_ref(category, inputs_seq, hidden0, params,
                                            compute_dtype=jnp.float32)
    assert jnp.allclose(logp, logp_f32, atol=1e-1, rtol=1e-1)
    assert jnp.allclose(hid, hid_f32, atol=1e-1, rtol=1e-1)

    # Non-divisible time chunk exercises the tail-masking path; must match exactly.
    logp_c, hid_c = rnn_forward_seq(category, inputs_seq, hidden0, params,
                                    time_chunk=5)
    jax.block_until_ready((logp_c, hid_c))
    assert jnp.allclose(logp_c, logp, atol=1e-6, rtol=1e-6)
    assert jnp.allclose(hid_c, hid, atol=1e-6, rtol=1e-6)

    # bf16 log-prob writeback path (halves output HBM traffic), looser tolerance.
    logp_b16, hid_b16 = rnn_forward_seq(category, inputs_seq, hidden0, params,
                                        out_dtype=jnp.bfloat16)
    jax.block_until_ready((logp_b16, hid_b16))
    assert jnp.allclose(logp_b16.astype(jnp.float32), logp, atol=5e-2, rtol=5e-2)
    assert jnp.allclose(hid_b16, hid, atol=1e-6, rtol=1e-6)

    # Single-step API matching the PyTorch module signature.
    logp1, hid1 = rnn_forward(category, inputs_seq[0], hidden0, params)
    jax.block_until_ready((logp1, hid1))
    assert logp1.shape == (batch, output_size)
    assert hid1.shape == (batch, hidden_size)
    assert jnp.allclose(logp1, logp[0], atol=1e-5, rtol=1e-5)

    print("KERNEL_OK")
</pallas_src>

<mosaic_0001>
module attributes {stable_mosaic.version = 11 : i64} {
  func.func @rnn_chunk_kernel(%arg0: i32, %arg1: memref<8x56xf32, #tpu.memory_space<vmem>>, %arg2: memref<8x8x16xbf16, #tpu.memory_space<vmem>>, %arg3: memref<16x56xbf16, #tpu.memory_space<vmem>>, %arg4: memref<56x56xbf16, #tpu.memory_space<vmem>>, %arg5: memref<8x56xf32, #tpu.memory_space<vmem>>, %arg6: memref<56x128xbf16, #tpu.memory_space<vmem>>, %arg7: memref<1x128xf32, #tpu.memory_space<vmem>>, %arg8: memref<8x8x128xf32, #tpu.memory_space<vmem>>, %arg9: memref<8x32xf32, #tpu.memory_space<vmem>>, %arg10: memref<8x56xf32, #tpu.memory_space<vmem>>) attributes {dimension_semantics = [#tpu.dimension_semantics<arbitrary>], iteration_bounds = array<i64: 1>, scalar_prefetch = 0 : i64, scratch_operands = 1 : i64, tpu.core_type = #tpu.core_type<tc>, window_params = [{pipeline_mode = #tpu.pipeline_mode<synchronous>, transform_indices = @transform_0, window_bounds = array<i64: 8, 56>}, {transform_indices = @transform_1, window_bounds = array<i64: 8, 8, 16>}, {pipeline_mode = #tpu.pipeline_mode<synchronous>, transform_indices = @transform_2, window_bounds = array<i64: 16, 56>}, {pipeline_mode = #tpu.pipeline_mode<synchronous>, transform_indices = @transform_3, window_bounds = array<i64: 56, 56>}, {pipeline_mode = #tpu.pipeline_mode<synchronous>, transform_indices = @transform_4, window_bounds = array<i64: 8, 56>}, {pipeline_mode = #tpu.pipeline_mode<synchronous>, transform_indices = @transform_5, window_bounds = array<i64: 56, 128>}, {pipeline_mode = #tpu.pipeline_mode<synchronous>, transform_indices = @transform_6, window_bounds = array<i64: 1, 128>}, {transform_indices = @transform_7, window_bounds = array<i64: 8, 8, 128>}, {pipeline_mode = #tpu.pipeline_mode<synchronous>, transform_indices = @transform_8, window_bounds = array<i64: 8, 32>}]} {
    %c0_i32 = arith.constant 0 : i32
    %0 = arith.cmpi eq, %arg0, %c0_i32 : i32
    %1 = arith.extui %0 : i1 to i32
    %c0_i32_0 = arith.constant 0 : i32
    %2 = arith.cmpi ne, %1, %c0_i32_0 : i32
    scf.if %2 {
      %c0_96 = arith.constant 0 : index
      %c0_97 = arith.constant 0 : index
      %205 = vector.load %arg1[%c0_96, %c0_97] : memref<8x56xf32, #tpu.memory_space<vmem>>, vector<8x56xf32>
      %c0_98 = arith.constant 0 : index
      %c0_99 = arith.constant 0 : index
      %206 = vector.load %arg10[%c0_98, %c0_99] : memref<8x56xf32, #tpu.memory_space<vmem>>, vector<8x56xf32>
      tpu.vector_store %arg10[%c0_98, %c0_99], %205 {strides = array<i32>} : memref<8x56xf32, #tpu.memory_space<vmem>>, vector<8x56xf32>,
    } else {
    }
    %c0 = arith.constant 0 : index
    %c0_1 = arith.constant 0 : index
    %3 = vector.load %arg3[%c0, %c0_1] : memref<16x56xbf16, #tpu.memory_space<vmem>>, vector<16x56xbf16>
    %c0_2 = arith.constant 0 : index
    %c0_3 = arith.constant 0 : index
    %4 = vector.load %arg4[%c0_2, %c0_3] : memref<56x56xbf16, #tpu.memory_space<vmem>>, vector<56x56xbf16>
    %c0_4 = arith.constant 0 : index
    %c0_5 = arith.constant 0 : index
    %5 = vector.load %arg5[%c0_4, %c0_5] : memref<8x56xf32, #tpu.memory_space<vmem>>, vector<8x56xf32>
    %c0_6 = arith.constant 0 : index
    %c0_7 = arith.constant 0 : index
    %6 = vector.load %arg6[%c0_6, %c0_7] : memref<56x128xbf16, #tpu.memory_space<vmem>>, vector<56x128xbf16>
    %c0_8 = arith.constant 0 : index
    %c0_9 = arith.constant 0 : index
    %7 = vector.load %arg7[%c0_8, %c0_9] : memref<1x128xf32, #tpu.memory_space<vmem>>, vector<1x128xf32>
    %c0_10 = arith.constant 0 : index
    %c0_11 = arith.constant 0 : index
    %8 = vector.load %arg10[%c0_10, %c0_11] : memref<8x56xf32, #tpu.memory_space<vmem>>, vector<8x56xf32>
    %c0_12 = arith.constant 0 : index
    %c0_13 = arith.constant 0 : index
    %c0_14 = arith.constant 0 : index
    %9 = vector.load %arg2[%c0_12, %c0_13, %c0_14] : memref<8x8x16xbf16, #tpu.memory_space<vmem>>, vector<1x8x16xbf16>
    %10 = vector.shape_cast %9 : vector<1x8x16xbf16> to vector<8x16xbf16>
    %cst = arith.constant dense<0.000000e+00> : vector<8x56xf32>
    %11 = tpu.matmul %10, %3, %cst {dimension_numbers = #tpu.dot_dimension_numbers<[1], [0], [0], [1], [0, 0, 1, 1], [], []>} : vector<8x16xbf16>, vector<16x56xbf16>, vector<8x56xf32> -> vector<8x56xf32>
    %12 = arith.truncf %8 : vector<8x56xf32> to vector<8x56xbf16>
    %cst_15 = arith.constant dense<0.000000e+00> : vector<8x56xf32>
    %13 = tpu.matmul %12, %4, %cst_15 {dimension_numbers = #tpu.dot_dimension_numbers<[1], [0], [0], [1], [0, 0, 1, 1], [], []>} : vector<8x56xbf16>, vector<56x56xbf16>, vector<8x56xf32> -> vector<8x56xf32>
    %14 = arith.addf %11, %13 : vector<8x56xf32>
    %15 = arith.addf %14, %5 : vector<8x56xf32>
    %16 = arith.truncf %15 : vector<8x56xf32> to vector<8x56xbf16>
    %cst_16 = arith.constant dense<0.000000e+00> : vector<8x128xf32>
    %17 = tpu.matmul %16, %6, %cst_16 {dimension_numbers = #tpu.dot_dimension_numbers<[1], [0], [0], [1], [0, 0, 1, 1], [], []>} : vector<8x56xbf16>, vector<56x128xbf16>, vector<8x128xf32> -> vector<8x128xf32>
    %18 = vector.broadcast %7 : vector<1x128xf32> to vector<8x128xf32>
    %19 = arith.addf %17, %18 : vector<8x128xf32>
    %cst_17 = arith.constant dense<0xFF800000> : vector<8xf32>
    %20 = vector.multi_reduction <maximumf>, %19, %cst_17 [1] : vector<8x128xf32> to vector<8xf32>
    %21 = vector.shape_cast %20 : vector<8xf32> to vector<8x1xf32>
    %22 = vector.broadcast %21 : vector<8x1xf32> to vector<8x128xf32>
    %23 = arith.subf %19, %22 : vector<8x128xf32>
    %24 = math.exp %23 : vector<8x128xf32>
    %cst_18 = arith.constant dense<0.000000e+00> : vector<8xf32>
    %25 = vector.multi_reduction <add>, %24, %cst_18 [1] : vector<8x128xf32> to vector<8xf32>
    %26 = vector.shape_cast %25 : vector<8xf32> to vector<8x1xf32>
    %27 = math.log %26 : vector<8x1xf32>
    %28 = vector.broadcast %27 : vector<8x1xf32> to vector<8x128xf32>
    %29 = arith.subf %23, %28 : vector<8x128xf32>
    %c0_19 = arith.constant 0 : index
    %c0_20 = arith.constant 0 : index
    %c0_21 = arith.constant 0 : index
    %30 = vector.load %arg8[%c0_19, %c0_20, %c0_21] : memref<8x8x128xf32, #tpu.memory_space<vmem>>, vector<1x8x128xf32>
    %31 = vector.shape_cast %30 : vector<1x8x128xf32> to vector<8x128xf32>
    %32 = vector.shape_cast %29 : vector<8x128xf32> to vector<1x8x128xf32>
    tpu.vector_store %arg8[%c0_19, %c0_20, %c0_21], %32 {strides = array<i32>} : memref<8x8x128xf32, #tpu.memory_space<vmem>>, vector<1x8x128xf32>,
    %c1 = arith.constant 1 : index
    %c0_22 = arith.constant 0 : index
    %c0_23 = arith.constant 0 : index
    %33 = vector.load %arg2[%c1, %c0_22, %c0_23] : memref<8x8x16xbf16, #tpu.memory_space<vmem>>, vector<1x8x16xbf16>
    %34 = vector.shape_cast %33 : vector<1x8x16xbf16> to vector<8x16xbf16>
    %cst_24 = arith.constant dense<0.000000e+00> : vector<8x56xf32>
    %35 = tpu.matmul %34, %3, %cst_24 {dimension_numbers = #tpu.dot_dimension_numbers<[1], [0], [0], [1], [0, 0, 1, 1], [], []>} : vector<8x16xbf16>, vector<16x56xbf16>, vector<8x56xf32> -> vector<8x56xf32>
    %36 = arith.truncf %15 : vector<8x56xf32> to vector<8x56xbf16>
    %cst_25 = arith.constant dense<0.000000e+00> : vector<8x56xf32>
    %37 = tpu.matmul %36, %4, %cst_25 {dimension_numbers = #tpu.dot_dimension_numbers<[1], [0], [0], [1], [0, 0, 1, 1], [], []>} : vector<8x56xbf16>, vector<56x56xbf16>, vector<8x56xf32> -> vector<8x56xf32>
    %38 = arith.addf %35, %37 : vector<8x56xf32>
    %39 = arith.addf %38, %5 : vector<8x56xf32>
    %40 = arith.truncf %39 : vector<8x56xf32> to vector<8x56xbf16>
    %cst_26 = arith.constant dense<0.000000e+00> : vector<8x128xf32>
    %41 = tpu.matmul %40, %6, %cst_26 {dimension_numbers = #tpu.dot_dimension_numbers<[1], [0], [0], [1], [0, 0, 1, 1], [], []>} : vector<8x56xbf16>, vector<56x128xbf16>, vector<8x128xf32> -> vector<8x128xf32>
    %42 = vector.broadcast %7 : vector<1x128xf32> to vector<8x128xf32>
    %43 = arith.addf %41, %42 : vector<8x128xf32>
    %cst_27 = arith.constant dense<0xFF800000> : vector<8xf32>
    %44 = vector.multi_reduction <maximumf>, %43, %cst_27 [1] : vector<8x128xf32> to vector<8xf32>
    %45 = vector.shape_cast %44 : vector<8xf32> to vector<8x1xf32>
    %46 = vector.broadcast %45 : vector<8x1xf32> to vector<8x128xf32>
    %47 = arith.subf %43, %46 : vector<8x128xf32>
    %48 = math.exp %47 : vector<8x128xf32>
    %cst_28 = arith.constant dense<0.000000e+00> : vector<8xf32>
    %49 = vector.multi_reduction <add>, %48, %cst_28 [1] : vector<8x128xf32> to vector<8xf32>
    %50 = vector.shape_cast %49 : vector<8xf32> to vector<8x1xf32>
    %51 = math.log %50 : vector<8x1xf32>
    %52 = vector.broadcast %51 : vector<8x1xf32> to vector<8x128xf32>
    %53 = arith.subf %47, %52 : vector<8x128xf32>
    %c1_29 = arith.constant 1 : index
    %c0_30 = arith.constant 0 : index
    %c0_31 = arith.constant 0 : index
    %54 = vector.load %arg8[%c1_29, %c0_30, %c0_31] : memref<8x8x128xf32, #tpu.memory_space<vmem>>, vector<1x8x128xf32>
    %55 = vector.shape_cast %54 : vector<1x8x128xf32> to vector<8x128xf32>
    %56 = vector.shape_cast %53 : vector<8x128xf32> to vector<1x8x128xf32>
    tpu.vector_store %arg8[%c1_29, %c0_30, %c0_31], %56 {strides = array<i32>} : memref<8x8x128xf32, #tpu.memory_space<vmem>>, vector<1x8x128xf32>,
    %c2 = arith.constant 2 : index
    %c0_32 = arith.constant 0 : index
    %c0_33 = arith.constant 0 : index
    %57 = vector.load %arg2[%c2, %c0_32, %c0_33] : memref<8x8x16xbf16, #tpu.memory_space<vmem>>, vector<1x8x16xbf16>
    %58 = vector.shape_cast %57 : vector<1x8x16xbf16> to vector<8x16xbf16>
    %cst_34 = arith.constant dense<0.000000e+00> : vector<8x56xf32>
    %59 = tpu.matmul %58, %3, %cst_34 {dimension_numbers = #tpu.dot_dimension_numbers<[1], [0], [0], [1], [0, 0, 1, 1], [], []>} : vector<8x16xbf16>, vector<16x56xbf16>, vector<8x56xf32> -> vector<8x56xf32>
    %60 = arith.truncf %39 : vector<8x56xf32> to vector<8x56xbf16>
    %cst_35 = arith.constant dense<0.000000e+00> : vector<8x56xf32>
    %61 = tpu.matmul %60, %4, %cst_35 {dimension_numbers = #tpu.dot_dimension_numbers<[1], [0], [0], [1], [0, 0, 1, 1], [], []>} : vector<8x56xbf16>, vector<56x56xbf16>, vector<8x56xf32> -> vector<8x56xf32>
    %62 = arith.addf %59, %61 : vector<8x56xf32>
    %63 = arith.addf %62, %5 : vector<8x56xf32>
    %64 = arith.truncf %63 : vector<8x56xf32> to vector<8x56xbf16>
    %cst_36 = arith.constant dense<0.000000e+00> : vector<8x128xf32>
    %65 = tpu.matmul %64, %6, %cst_36 {dimension_numbers = #tpu.dot_dimension_numbers<[1], [0], [0], [1], [0, 0, 1, 1], [], []>} : vector<8x56xbf16>, vector<56x128xbf16>, vector<8x128xf32> -> vector<8x128xf32>
    %66 = vector.broadcast %7 : vector<1x128xf32> to vector<8x128xf32>
    %67 = arith.addf %65, %66 : vector<8x128xf32>
    %cst_37 = arith.constant dense<0xFF800000> : vector<8xf32>
    %68 = vector.multi_reduction <maximumf>, %67, %cst_37 [1] : vector<8x128xf32> to vector<8xf32>
    %69 = vector.shape_cast %68 : vector<8xf32> to vector<8x1xf32>
    %70 = vector.broadcast %69 : vector<8x1xf32> to vector<8x128xf32>
    %71 = arith.subf %67, %70 : vector<8x128xf32>
    %72 = math.exp %71 : vector<8x128xf32>
    %cst_38 = arith.constant dense<0.000000e+00> : vector<8xf32>
    %73 = vector.multi_reduction <add>, %72, %cst_38 [1] : vector<8x128xf32> to vector<8xf32>
    %74 = vector.shape_cast %73 : vector<8xf32> to vector<8x1xf32>
    %75 = math.log %74 : vector<8x1xf32>
    %76 = vector.broadcast %75 : vector<8x1xf32> to vector<8x128xf32>
    %77 = arith.subf %71, %76 : vector<8x128xf32>
    %c2_39 = arith.constant 2 : index
    %c0_40 = arith.constant 0 : index
    %c0_41 = arith.constant 0 : index
    %78 = vector.load %arg8[%c2_39, %c0_40, %c0_41] : memref<8x8x128xf32, #tpu.memory_space<vmem>>, vector<1x8x128xf32>
    %79 = vector.shape_cast %78 : vector<1x8x128xf32> to vector<8x128xf32>
    %80 = vector.shape_cast %77 : vector<8x128xf32> to vector<1x8x128xf32>
    tpu.vector_store %arg8[%c2_39, %c0_40, %c0_41], %80 {strides = array<i32>} : memref<8x8x128xf32, #tpu.memory_space<vmem>>, vector<1x8x128xf32>,
    %c3 = arith.constant 3 : index
    %c0_42 = arith.constant 0 : index
    %c0_43 = arith.constant 0 : index
    %81 = vector.load %arg2[%c3, %c0_42, %c0_43] : memref<8x8x16xbf16, #tpu.memory_space<vmem>>, vector<1x8x16xbf16>
    %82 = vector.shape_cast %81 : vector<1x8x16xbf16> to vector<8x16xbf16>
    %cst_44 = arith.constant dense<0.000000e+00> : vector<8x56xf32>
    %83 = tpu.matmul %82, %3, %cst_44 {dimension_numbers = #tpu.dot_dimension_numbers<[1], [0], [0], [1], [0, 0, 1, 1], [], []>} : vector<8x16xbf16>, vector<16x56xbf16>, vector<8x56xf32> -> vector<8x56xf32>
    %84 = arith.truncf %63 : vector<8x56xf32> to vector<8x56xbf16>
    %cst_45 = arith.constant dense<0.000000e+00> : vector<8x56xf32>
    %85 = tpu.matmul %84, %4, %cst_45 {dimension_numbers = #tpu.dot_dimension_numbers<[1], [0], [0], [1], [0, 0, 1, 1], [], []>} : vector<8x56xbf16>, vector<56x56xbf16>, vector<8x56xf32> -> vector<8x56xf32>
    %86 = arith.addf %83, %85 : vector<8x56xf32>
    %87 = arith.addf %86, %5 : vector<8x56xf32>
    %88 = arith.truncf %87 : vector<8x56xf32> to vector<8x56xbf16>
    %cst_46 = arith.constant dense<0.000000e+00> : vector<8x128xf32>
    %89 = tpu.matmul %88, %6, %cst_46 {dimension_numbers = #tpu.dot_dimension_numbers<[1], [0], [0], [1], [0, 0, 1, 1], [], []>} : vector<8x56xbf16>, vector<56x128xbf16>, vector<8x128xf32> -> vector<8x128xf32>
    %90 = vector.broadcast %7 : vector<1x128xf32> to vector<8x128xf32>
    %91 = arith.addf %89, %90 : vector<8x128xf32>
    %cst_47 = arith.constant dense<0xFF800000> : vector<8xf32>
    %92 = vector.multi_reduction <maximumf>, %91, %cst_47 [1] : vector<8x128xf32> to vector<8xf32>
    %93 = vector.shape_cast %92 : vector<8xf32> to vector<8x1xf32>
    %94 = vector.broadcast %93 : vector<8x1xf32> to vector<8x128xf32>
    %95 = arith.subf %91, %94 : vector<8x128xf32>
    %96 = math.exp %95 : vector<8x128xf32>
    %cst_48 = arith.constant dense<0.000000e+00> : vector<8xf32>
    %97 = vector.multi_reduction <add>, %96, %cst_48 [1] : vector<8x128xf32> to vector<8xf32>
    %98 = vector.shape_cast %97 : vector<8xf32> to vector<8x1xf32>
    %99 = math.log %98 : vector<8x1xf32>
    %100 = vector.broadcast %99 : vector<8x1xf32> to vector<8x128xf32>
    %101 = arith.subf %95, %100 : vector<8x128xf32>
    %c3_49 = arith.constant 3 : index
    %c0_50 = arith.constant 0 : index
    %c0_51 = arith.constant 0 : index
    %102 = vector.load %arg8[%c3_49, %c0_50, %c0_51] : memref<8x8x128xf32, #tpu.memory_space<vmem>>, vector<1x8x128xf32>
    %103 = vector.shape_cast %102 : vector<1x8x128xf32> to vector<8x128xf32>
    %104 = vector.shape_cast %101 : vector<8x128xf32> to vector<1x8x128xf32>
    tpu.vector_store %arg8[%c3_49, %c0_50, %c0_51], %104 {strides = array<i32>} : memref<8x8x128xf32, #tpu.memory_space<vmem>>, vector<1x8x128xf32>,
    %c4 = arith.constant 4 : index
    %c0_52 = arith.constant 0 : index
    %c0_53 = arith.constant 0 : index
    %105 = vector.load %arg2[%c4, %c0_52, %c0_53] : memref<8x8x16xbf16, #tpu.memory_space<vmem>>, vector<1x8x16xbf16>
    %106 = vector.shape_cast %105 : vector<1x8x16xbf16> to vector<8x16xbf16>
    %cst_54 = arith.constant dense<0.000000e+00> : vector<8x56xf32>
    %107 = tpu.matmul %106, %3, %cst_54 {dimension_numbers = #tpu.dot_dimension_numbers<[1], [0], [0], [1], [0, 0, 1, 1], [], []>} : vector<8x16xbf16>, vector<16x56xbf16>, vector<8x56xf32> -> vector<8x56xf32>
    %108 = arith.truncf %87 : vector<8x56xf32> to vector<8x56xbf16>
    %cst_55 = arith.constant dense<0.000000e+00> : vector<8x56xf32>
    %109 = tpu.matmul %108, %4, %cst_55 {dimension_numbers = #tpu.dot_dimension_numbers<[1], [0], [0], [1], [0, 0, 1, 1], [], []>} : vector<8x56xbf16>, vector<56x56xbf16>, vector<8x56xf32> -> vector<8x56xf32>
    %110 = arith.addf %107, %109 : vector<8x56xf32>
    %111 = arith.addf %110, %5 : vector<8x56xf32>
    %112 = arith.truncf %111 : vector<8x56xf32> to vector<8x56xbf16>
    %cst_56 = arith.constant dense<0.000000e+00> : vector<8x128xf32>
    %113 = tpu.matmul %112, %6, %cst_56 {dimension_numbers = #tpu.dot_dimension_numbers<[1], [0], [0], [1], [0, 0, 1, 1], [], []>} : vector<8x56xbf16>, vector<56x128xbf16>, vector<8x128xf32> -> vector<8x128xf32>
    %114 = vector.broadcast %7 : vector<1x128xf32> to vector<8x128xf32>
    %115 = arith.addf %113, %114 : vector<8x128xf32>
    %cst_57 = arith.constant dense<0xFF800000> : vector<8xf32>
    %116 = vector.multi_reduction <maximumf>, %115, %cst_57 [1] : vector<8x128xf32> to vector<8xf32>
    %117 = vector.shape_cast %116 : vector<8xf32> to vector<8x1xf32>
    %118 = vector.broadcast %117 : vector<8x1xf32> to vector<8x128xf32>
    %119 = arith.subf %115, %118 : vector<8x128xf32>
    %120 = math.exp %119 : vector<8x128xf32>
    %cst_58 = arith.constant dense<0.000000e+00> : vector<8xf32>
    %121 = vector.multi_reduction <add>, %120, %cst_58 [1] : vector<8x128xf32> to vector<8xf32>
    %122 = vector.shape_cast %121 : vector<8xf32> to vector<8x1xf32>
    %123 = math.log %122 : vector<8x1xf32>
    %124 = vector.broadcast %123 : vector<8x1xf32> to vector<8x128xf32>
    %125 = arith.subf %119, %124 : vector<8x128xf32>
    %c4_59 = arith.constant 4 : index
    %c0_60 = arith.constant 0 : index
    %c0_61 = arith.constant 0 : index
    %126 = vector.load %arg8[%c4_59, %c0_60, %c0_61] : memref<8x8x128xf32, #tpu.memory_space<vmem>>, vector<1x8x128xf32>
    %127 = vector.shape_cast %126 : vector<1x8x128xf32> to vector<8x128xf32>
    %128 = vector.shape_cast %125 : vector<8x128xf32> to vector<1x8x128xf32>
    tpu.vector_store %arg8[%c4_59, %c0_60, %c0_61], %128 {strides = array<i32>} : memref<8x8x128xf32, #tpu.memory_space<vmem>>, vector<1x8x128xf32>,
    %c5 = arith.constant 5 : index
    %c0_62 = arith.constant 0 : index
    %c0_63 = arith.constant 0 : index
    %129 = vector.load %arg2[%c5, %c0_62, %c0_63] : memref<8x8x16xbf16, #tpu.memory_space<vmem>>, vector<1x8x16xbf16>
    %130 = vector.shape_cast %129 : vector<1x8x16xbf16> to vector<8x16xbf16>
    %cst_64 = arith.constant dense<0.000000e+00> : vector<8x56xf32>
    %131 = tpu.matmul %130, %3, %cst_64 {dimension_numbers = #tpu.dot_dimension_numbers<[1], [0], [0], [1], [0, 0, 1, 1], [], []>} : vector<8x16xbf16>, vector<16x56xbf16>, vector<8x56xf32> -> vector<8x56xf32>
    %132 = arith.truncf %111 : vector<8x56xf32> to vector<8x56xbf16>
    %cst_65 = arith.constant dense<0.000000e+00> : vector<8x56xf32>
    %133 = tpu.matmul %132, %4, %cst_65 {dimension_numbers = #tpu.dot_dimension_numbers<[1], [0], [0], [1], [0, 0, 1, 1], [], []>} : vector<8x56xbf16>, vector<56x56xbf16>, vector<8x56xf32> -> vector<8x56xf32>
    %134 = arith.addf %131, %133 : vector<8x56xf32>
    %135 = arith.addf %134, %5 : vector<8x56xf32>
    %136 = arith.truncf %135 : vector<8x56xf32> to vector<8x56xbf16>
    %cst_66 = arith.constant dense<0.000000e+00> : vector<8x128xf32>
    %137 = tpu.matmul %136, %6, %cst_66 {dimension_numbers = #tpu.dot_dimension_numbers<[1], [0], [0], [1], [0, 0, 1, 1], [], []>} : vector<8x56xbf16>, vector<56x128xbf16>, vector<8x128xf32> -> vector<8x128xf32>
    %138 = vector.broadcast %7 : vector<1x128xf32> to vector<8x128xf32>
    %139 = arith.addf %137, %138 : vector<8x128xf32>
    %cst_67 = arith.constant dense<0xFF800000> : vector<8xf32>
    %140 = vector.multi_reduction <maximumf>, %139, %cst_67 [1] : vector<8x128xf32> to vector<8xf32>
    %141 = vector.shape_cast %140 : vector<8xf32> to vector<8x1xf32>
    %142 = vector.broadcast %141 : vector<8x1xf32> to vector<8x128xf32>
    %143 = arith.subf %139, %142 : vector<8x128xf32>
    %144 = math.exp %143 : vector<8x128xf32>
    %cst_68 = arith.constant dense<0.000000e+00> : vector<8xf32>
    %145 = vector.multi_reduction <add>, %144, %cst_68 [1] : vector<8x128xf32> to vector<8xf32>
    %146 = vector.shape_cast %145 : vector<8xf32> to vector<8x1xf32>
    %147 = math.log %146 : vector<8x1xf32>
    %148 = vector.broadcast %147 : vector<8x1xf32> to vector<8x128xf32>
    %149 = arith.subf %143, %148 : vector<8x128xf32>
    %c5_69 = arith.constant 5 : index
    %c0_70 = arith.constant 0 : index
    %c0_71 = arith.constant 0 : index
    %150 = vector.load %arg8[%c5_69, %c0_70, %c0_71] : memref<8x8x128xf32, #tpu.memory_space<vmem>>, vector<1x8x128xf32>
    %151 = vector.shape_cast %150 : vector<1x8x128xf32> to vector<8x128xf32>
    %152 = vector.shape_cast %149 : vector<8x128xf32> to vector<1x8x128xf32>
    tpu.vector_store %arg8[%c5_69, %c0_70, %c0_71], %152 {strides = array<i32>} : memref<8x8x128xf32, #tpu.memory_space<vmem>>, vector<1x8x128xf32>,
    %c6 = arith.constant 6 : index
    %c0_72 = arith.constant 0 : index
    %c0_73 = arith.constant 0 : index
    %153 = vector.load %arg2[%c6, %c0_72, %c0_73] : memref<8x8x16xbf16, #tpu.memory_space<vmem>>, vector<1x8x16xbf16>
    %154 = vector.shape_cast %153 : vector<1x8x16xbf16> to vector<8x16xbf16>
    %cst_74 = arith.constant dense<0.000000e+00> : vector<8x56xf32>
    %155 = tpu.matmul %154, %3, %cst_74 {dimension_numbers = #tpu.dot_dimension_numbers<[1], [0], [0], [1], [0, 0, 1, 1], [], []>} : vector<8x16xbf16>, vector<16x56xbf16>, vector<8x56xf32> -> vector<8x56xf32>
    %156 = arith.truncf %135 : vector<8x56xf32> to vector<8x56xbf16>
    %cst_75 = arith.constant dense<0.000000e+00> : vector<8x56xf32>
    %157 = tpu.matmul %156, %4, %cst_75 {dimension_numbers = #tpu.dot_dimension_numbers<[1], [0], [0], [1], [0, 0, 1, 1], [], []>} : vector<8x56xbf16>, vector<56x56xbf16>, vector<8x56xf32> -> vector<8x56xf32>
    %158 = arith.addf %155, %157 : vector<8x56xf32>
    %159 = arith.addf %158, %5 : vector<8x56xf32>
    %160 = arith.truncf %159 : vector<8x56xf32> to vector<8x56xbf16>
    %cst_76 = arith.constant dense<0.000000e+00> : vector<8x128xf32>
    %161 = tpu.matmul %160, %6, %cst_76 {dimension_numbers = #tpu.dot_dimension_numbers<[1], [0], [0], [1], [0, 0, 1, 1], [], []>} : vector<8x56xbf16>, vector<56x128xbf16>, vector<8x128xf32> -> vector<8x128xf32>
    %162 = vector.broadcast %7 : vector<1x128xf32> to vector<8x128xf32>
    %163 = arith.addf %161, %162 : vector<8x128xf32>
    %cst_77 = arith.constant dense<0xFF800000> : vector<8xf32>
    %164 = vector.multi_reduction <maximumf>, %163, %cst_77 [1] : vector<8x128xf32> to vector<8xf32>
    %165 = vector.shape_cast %164 : vector<8xf32> to vector<8x1xf32>
    %166 = vector.broadcast %165 : vector<8x1xf32> to vector<8x128xf32>
    %167 = arith.subf %163, %166 : vector<8x128xf32>
    %168 = math.exp %167 : vector<8x128xf32>
    %cst_78 = arith.constant dense<0.000000e+00> : vector<8xf32>
    %169 = vector.multi_reduction <add>, %168, %cst_78 [1] : vector<8x128xf32> to vector<8xf32>
    %170 = vector.shape_cast %169 : vector<8xf32> to vector<8x1xf32>
    %171 = math.log %170 : vector<8x1xf32>
    %172 = vector.broadcast %171 : vector<8x1xf32> to vector<8x128xf32>
    %173 = arith.subf %167, %172 : vector<8x128xf32>
    %c6_79 = arith.constant 6 : index
    %c0_80 = arith.constant 0 : index
    %c0_81 = arith.constant 0 : index
    %174 = vector.load %arg8[%c6_79, %c0_80, %c0_81] : memref<8x8x128xf32, #tpu.memory_space<vmem>>, vector<1x8x128xf32>
    %175 = vector.shape_cast %174 : vector<1x8x128xf32> to vector<8x128xf32>
    %176 = vector.shape_cast %173 : vector<8x128xf32> to vector<1x8x128xf32>
    tpu.vector_store %arg8[%c6_79, %c0_80, %c0_81], %176 {strides = array<i32>} : memref<8x8x128xf32, #tpu.memory_space<vmem>>, vector<1x8x128xf32>,
    %c7 = arith.constant 7 : index
    %c0_82 = arith.constant 0 : index
    %c0_83 = arith.constant 0 : index
    %177 = vector.load %arg2[%c7, %c0_82, %c0_83] : memref<8x8x16xbf16, #tpu.memory_space<vmem>>, vector<1x8x16xbf16>
    %178 = vector.shape_cast %177 : vector<1x8x16xbf16> to vector<8x16xbf16>
    %cst_84 = arith.constant dense<0.000000e+00> : vector<8x56xf32>
    %179 = tpu.matmul %178, %3, %cst_84 {dimension_numbers = #tpu.dot_dimension_numbers<[1], [0], [0], [1], [0, 0, 1, 1], [], []>} : vector<8x16xbf16>, vector<16x56xbf16>, vector<8x56xf32> -> vector<8x56xf32>
    %180 = arith.truncf %159 : vector<8x56xf32> to vector<8x56xbf16>
    %cst_85 = arith.constant dense<0.000000e+00> : vector<8x56xf32>
    %181 = tpu.matmul %180, %4, %cst_85 {dimension_numbers = #tpu.dot_dimension_numbers<[1], [0], [0], [1], [0, 0, 1, 1], [], []>} : vector<8x56xbf16>, vector<56x56xbf16>, vector<8x56xf32> -> vector<8x56xf32>
    %182 = arith.addf %179, %181 : vector<8x56xf32>
    %183 = arith.addf %182, %5 : vector<8x56xf32>
    %184 = arith.truncf %183 : vector<8x56xf32> to vector<8x56xbf16>
    %cst_86 = arith.constant dense<0.000000e+00> : vector<8x128xf32>
    %185 = tpu.matmul %184, %6, %cst_86 {dimension_numbers = #tpu.dot_dimension_numbers<[1], [0], [0], [1], [0, 0, 1, 1], [], []>} : vector<8x56xbf16>, vector<56x128xbf16>, vector<8x128xf32> -> vector<8x128xf32>
    %186 = vector.broadcast %7 : vector<1x128xf32> to vector<8x128xf32>
    %187 = arith.addf %185, %186 : vector<8x128xf32>
    %cst_87 = arith.constant dense<0xFF800000> : vector<8xf32>
    %188 = vector.multi_reduction <maximumf>, %187, %cst_87 [1] : vector<8x128xf32> to vector<8xf32>
    %189 = vector.shape_cast %188 : vector<8xf32> to vector<8x1xf32>
    %190 = vector.broadcast %189 : vector<8x1xf32> to vector<8x128xf32>
    %191 = arith.subf %187, %190 : vector<8x128xf32>
    %192 = math.exp %191 : vector<8x128xf32>
    %cst_88 = arith.constant dense<0.000000e+00> : vector<8xf32>
    %193 = vector.multi_reduction <add>, %192, %cst_88 [1] : vector<8x128xf32> to vector<8xf32>
    %194 = vector.shape_cast %193 : vector<8xf32> to vector<8x1xf32>
    %195 = math.log %194 : vector<8x1xf32>
    %196 = vector.broadcast %195 : vector<8x1xf32> to vector<8x128xf32>
    %197 = arith.subf %191, %196 : vector<8x128xf32>
    %c7_89 = arith.constant 7 : index
    %c0_90 = arith.constant 0 : index
    %c0_91 = arith.constant 0 : index
    %198 = vector.load %arg8[%c7_89, %c0_90, %c0_91] : memref<8x8x128xf32, #tpu.memory_space<vmem>>, vector<1x8x128xf32>
    %199 = vector.shape_cast %198 : vector<1x8x128xf32> to vector<8x128xf32>
    %200 = vector.shape_cast %197 : vector<8x128xf32> to vector<1x8x128xf32>
    tpu.vector_store %arg8[%c7_89, %c0_90, %c0_91], %200 {strides = array<i32>} : memref<8x8x128xf32, #tpu.memory_space<vmem>>, vector<1x8x128xf32>,
    %c0_92 = arith.constant 0 : index
    %c0_93 = arith.constant 0 : index
    %201 = vector.load %arg10[%c0_92, %c0_93] : memref<8x56xf32, #tpu.memory_space<vmem>>, vector<8x56xf32>
    tpu.vector_store %arg10[%c0_92, %c0_93], %183 {strides = array<i32>} : memref<8x56xf32, #tpu.memory_space<vmem>>, vector<8x56xf32>,
    %c0_i32_94 = arith.constant 0 : i32
    %202 = arith.cmpi eq, %arg0, %c0_i32_94 : i32
    %203 = arith.extui %202 : i1 to i32
    %c0_i32_95 = arith.constant 0 : i32
    %204 = arith.cmpi ne, %203, %c0_i32_95 : i32
    scf.if %204 {
      %205 = vector.extract_strided_slice %183 {offsets = [0, 0], sizes = [8, 32], strides = [1, 1]} : vector<8x56xf32> to vector<8x32xf32>
      %c0_96 = arith.constant 0 : index
      %c0_97 = arith.constant 0 : index
      %206 = vector.load %arg9[%c0_96, %c0_97] : memref<8x32xf32, #tpu.memory_space<vmem>>, vector<8x32xf32>
      tpu.vector_store %arg9[%c0_96, %c0_97], %205 {strides = array<i32>} : memref<8x32xf32, #tpu.memory_space<vmem>>, vector<8x32xf32>,
    } else {
    }
    return
  }
  func.func @transform_0(%arg0: i32) -> (i32, i32) {
    %c0_i32 = arith.constant 0 : i32
    %c0_i32_0 = arith.constant 0 : i32
    %c0_i32_1 = arith.constant 0 : i32
    return %c0_i32, %c0_i32_0 : i32, i32
  }
  func.func @transform_1(%arg0: i32) -> (i32, i32, i32) {
    %c0_i32 = arith.constant 0 : i32
    %c0_i32_0 = arith.constant 0 : i32
    %c0_i32_1 = arith.constant 0 : i32
    return %arg0, %c0_i32, %c0_i32_0 : i32, i32, i32
  }
  func.func @transform_2(%arg0: i32) -> (i32, i32) {
    %c0_i32 = arith.constant 0 : i32
    %c0_i32_0 = arith.constant 0 : i32
    %c0_i32_1 = arith.constant 0 : i32
    return %c0_i32, %c0_i32_0 : i32, i32
  }
  func.func @transform_3(%arg0: i32) -> (i32, i32) {
    %c0_i32 = arith.constant 0 : i32
    %c0_i32_0 = arith.constant 0 : i32
    %c0_i32_1 = arith.constant 0 : i32
    return %c0_i32, %c0_i32_0 : i32, i32
  }
  func.func @transform_4(%arg0: i32) -> (i32, i32) {
    %c0_i32 = arith.constant 0 : i32
    %c0_i32_0 = arith.constant 0 : i32
    %c0_i32_1 = arith.constant 0 : i32
    return %c0_i32, %c0_i32_0 : i32, i32
  }
  func.func @transform_5(%arg0: i32) -> (i32, i32) {
    %c0_i32 = arith.constant 0 : i32
    %c0_i32_0 = arith.constant 0 : i32
    %c0_i32_1 = arith.constant 0 : i32
    return %c0_i32, %c0_i32_0 : i32, i32
  }
  func.func @transform_6(%arg0: i32) -> (i32, i32) {
    %c0_i32 = arith.constant 0 : i32
    %c0_i32_0 = arith.constant 0 : i32
    %c0_i32_1 = arith.constant 0 : i32
    return %c0_i32, %c0_i32_0 : i32, i32
  }
  func.func @transform_7(%arg0: i32) -> (i32, i32, i32) {
    %c0_i32 = arith.constant 0 : i32
    %c0_i32_0 = arith.constant 0 : i32
    %c0_i32_1 = arith.constant 0 : i32
    return %arg0, %c0_i32, %c0_i32_0 : i32, i32, i32
  }
  func.func @transform_8(%arg0: i32) -> (i32, i32) {
    %c0_i32 = arith.constant 0 : i32
    %c0_i32_0 = arith.constant 0 : i32
    %c0_i32_1 = arith.constant 0 : i32
    return %c0_i32, %c0_i32_0 : i32, i32
  }
}

</mosaic_0001>

<bundles_post_ra>
// kernel: rnn_forward_seq.1
= control target key start
LH: loop header
LB: loop body
LE: loop exit
PB: predicated region body
PF: predicated region fallthrough
CT: control target
= control target key end

     0   :  { %vm82_vm0 = vcmask 1043456   ;;  %v1697_v0 = vmov 0.0   ;;  %vm1698_vm1 = vmmov 0   ;;  %vm34_vm2 = vcmask 457728   ;;  %s2116_s3 = inlined_call_operand.vmem [shape: bf16[56,56], index: 3, kind: input, shape index: {}]   ;;  %s2117_s0 = inlined_call_operand.vmem [shape: f32[8,56], index: 0, kind: input, shape index: {}]   ;;  %s2118_s2 = inlined_call_operand.vmem [shape: bf16[16,56], index: 2, kind: input, shape index: {}]   ;;  %s2119_s1 = inlined_call_operand.vmem [shape: bf16[8,8,16], index: 1, kind: input, shape index: {}]   ;;  %s2120_s5 = inlined_call_operand.vmem [shape: bf16[56,128], index: 5, kind: input, shape index: {}]   ;;  %s2121_s4 = inlined_call_operand.vmem [shape: f32[8,56], index: 4, kind: input, shape index: {}]   ;;  %s2122_s6 = inlined_call_operand.vmem [shape: f32[1,128], index: 6, kind: input, shape index: {}]   ;;  %s2123_s8 = inlined_call_operand.vmem [shape: f32[8,32], index: 8, kind: output, shape index: {1}]   ;;  %s2124_s7 = inlined_call_operand.vmem [shape: f32[8,8,128], index: 7, kind: output, shape index: {0}]  }
   0x1   :  { %1414 = vmatprep.subr.bf16.mxu0 %v1697_v0  ;;  %v1656_v1 = vld [vmem:[%s2116_s3 + $0x18] ss:$0 sps:$4 sm:$0xff]   ;;  %1422 = vmatprep.mubr.msk.bf16.mxu0 %vm1698_vm1, %v1697_v0  ;;  %v1760_v3 = vld [vmem:[%s2116_s3 + $0x10] sm:$0xff]   ;;  %v33_v4 = vld [vmem:[%s2117_s0] sm:$0xff]  ;;  %vm132_vm3 = vcmask 130048   ;;  %vm1260_vm4 = vcmask 261120  }
   0x2   :  { %1432 = vmatprep.subr.bf16.mxu1 %v1697_v0  ;;  %1440 = vmatprep.mubr.msk.bf16.mxu1 %vm1698_vm1, %v1697_v0  ;;  %v1754_v2 = vsel %vm82_vm0, %v1656_v1, 0  ;;  %35 = vst.msk [vmem:[#allocation2] sm:$0xff] %vm34_vm2, %v33_v4  ;;  %v1771_v5 = vld [vmem:[%s2116_s3 + $0x8] sm:$0xff]   ;;  %v1778_v6 = vld [vmem:[%s2116_s3] sm:$0xff]   ;;  %v1661_v11 = vld [vmem:[%s2120_s5 + $0x18] ss:$0 sps:$4 sm:$0xff]  }
   0x3   :  { %1415 = vmatpush3.bf16.msra.mxu0 %v1754_v2  ;;  %v1785_v9 = vld [vmem:[%s2118_s2] sm:$0xff]   ;;  %v1811_v12 = vsel %vm82_vm0, %v1661_v11, 0  ;;  %v1818_v13 = vld [vmem:[%s2120_s5 + $0x10] sm:$0xff]   ;;  %v1825_v14 = vld [vmem:[%s2120_s5 + $0x8] sm:$0xff]  }
   0x4   :  { %1416 = vmatprep.subr.bf16.mxu0 %v1697_v0  ;;  %v55_v10 = vld [vmem:[%s2119_s1] sm:$0xf]  ;;  %1433 = vmatpush3.bf16.msra.mxu1 %v1811_v12  ;;  %v1283_v28 = vld [vmem:[%s2119_s1 + $0x4] sm:$0xf]  ;;  %v1288_v46 = vld [vmem:[%s2119_s1 + $0x8] sm:$0xf] }
   0x5   :  { %1434 = vmatprep.subr.bf16.mxu1 %v1697_v0  ;;  %v1832_v15 = vld [vmem:[%s2120_s5] sm:$0xff]   ;;  %v1293_v63 = vld [vmem:[%s2119_s1 + $0xc] sm:$0xf] }
   0x6   :  { %v1839_v20 = vld [vmem:[%s2121_s4] sm:$0xff] }
   0x7   :  { %1417 = vmatpush3.bf16.msra.mxu0 %v1760_v3  ;;  %v1875_v29 = vld [vmem:[%s2122_s6] ss:$0 sm:$0xff] }
   0x8   :  { %1418 = vmatprep.subr.bf16.mxu0 %v1697_v0  ;;  %1435 = vmatpush3.bf16.msra.mxu1 %v1818_v13 }
   0x9   :  { %v54_v7 = vld [vmem:[#allocation2] sm:$0xff]  ;;  %1436 = vmatprep.subr.bf16.mxu1 %v1697_v0 }
   0xa   :  { %v56_v8 = vpack.c.bf16 %v54_v7, %v54_v7 }
   0xb   :  { %1419 = vmatpush3.bf16.msra.mxu0 %v1771_v5 }
   0xc   :  { %1420 = vmatprep.subr.bf16.mxu0 %v1697_v0  ;;  %1437 = vmatpush3.bf16.msra.mxu1 %v1825_v14 }
   0xd   :  { %1438 = vmatprep.subr.bf16.mxu1 %v1697_v0 }
   0xf   :  { %1421 = vmatpush3.bf16.msra.mxu0 %v1778_v6 }
  0x10   :  { %1426 = vmatprep.subr.bf16.mxu0 %v1697_v0  ;;  %1439 = vmatpush3.bf16.msra.mxu1 %v1832_v15 }
  0x11   :  { %1456 = vmatprep.subr.bf16.mxu1 %v1697_v0 }
  0x12   :  { %1423 = vmatmul.mubr.msk.bf16.vlgmr.msra.gmra.mxu0 %vm34_vm2, %v56_v8 }
  0x13   :  { %1427 = vmatpush3.bf16.msra.mxu0 %v1785_v9  ;;  %1428 = vmatprep.mubr.msk.bf16.mxu0 %vm1698_vm1, %v1697_v0 }
  0x14   :  { %1444 = vmatprep.subr.bf16.mxu0 %v1697_v0 }
  0x1a   :  { %1429 = vmatmul.mubr.msk.bf16.vlgmr.msra.gmra.mxu0 %vm132_vm3, %v55_v10 }
  0x1b   :  { %1445 = vmatpush3.bf16.msra.mxu0 %v1754_v2  ;;  %1452 = vmatprep.mubr.msk.bf16.mxu0 %vm1698_vm1, %v1697_v0 }
  0x1c   :  { %1446 = vmatprep.subr.bf16.mxu0 %v1697_v0 }
  0x1f   :  { %1447 = vmatpush3.bf16.msra.mxu0 %v1760_v3 }
  0x20   :  { %1448 = vmatprep.subr.bf16.mxu0 %v1697_v0 }
  0x23   :  { %1449 = vmatpush3.bf16.msra.mxu0 %v1771_v5 }
  0x24   :  { %1450 = vmatprep.subr.bf16.mxu0 %v1697_v0 }
  0x27   :  { %1451 = vmatpush3.bf16.msra.mxu0 %v1778_v6 }
  0x28   :  { %1474 = vmatprep.subr.bf16.mxu0 %v1697_v0 }
  0xd2   :  { %v120_v16 = vpop.f32.mrf.mxu0 }
  0xd4   :  { %v1424_v17 = vpop.f32.mrf.mxu0 }
  0xd6   :  { %v123_v18 = vpop.f32.mrf.mxu0 }
  0xd8   :  { %v1425_v19 = vpop.f32.mrf.mxu0 }
  0xda   :  { %v170_v21 = vpop.f32.mrf.mxu0 }
  0xdb   :  { %v171_v22 = vadd.f32 %v170_v21, %v120_v16 }
  0xdc   :  { %v1430_v23 = vpop.f32.mrf.mxu0 }
  0xdd   :  { %v176_v24 = vadd.f32 %v171_v22, %v1839_v20 }
  0xde   :  { %v173_v25 = vpop.f32.mrf.mxu0 }
  0xdf   :  { %v177_v26 = vpack.c.bf16 %v176_v24, %v176_v24 }
  0xe0   :  { %v1431_v27 = vpop.f32.mrf.mxu0 }
  0xe1   :  { %1441 = vmatmul.mubr.msk.bf16.vlgmr.msra.gmra.mxu1 %vm34_vm2, %v177_v26  ;;  %1453 = vmatmul.mubr.msk.bf16.vlgmr.msra.gmra.mxu0 %vm34_vm2, %v177_v26  ;;  %v1298_v27 = vld [vmem:[%s2119_s1 + $0x10] sm:$0xf] }
  0xe2   :  { %1457 = vmatpush3.bf16.msra.mxu1 %v1785_v9  ;;  %1458 = vmatprep.mubr.msk.bf16.mxu1 %vm1698_vm1, %v1697_v0 }
  0xe3   :  { %1462 = vmatprep.subr.bf16.mxu1 %v1697_v0  ;;  %1475 = vmatpush3.bf16.msra.mxu0 %v1754_v2 }
  0xe4   :  { %1476 = vmatprep.subr.bf16.mxu0 %v1697_v0  ;;  %1482 = vmatprep.mubr.msk.bf16.mxu0 %vm1698_vm1, %v1697_v0 }
  0xe7   :  { %1477 = vmatpush3.bf16.msra.mxu0 %v1760_v3 }
  0xe8   :  { %1478 = vmatprep.subr.bf16.mxu0 %v1697_v0 }
  0xe9   :  { %1459 = vmatmul.mubr.msk.bf16.vlgmr.msra.gmra.mxu1 %vm132_vm3, %v1283_v28 }
  0xea   :  { %1463 = vmatpush3.bf16.msra.mxu1 %v1811_v12  ;;  %1470 = vmatprep.mubr.msk.bf16.mxu1 %vm1698_vm1, %v1697_v0 }
  0xeb   :  { %1464 = vmatprep.subr.bf16.mxu1 %v1697_v0  ;;  %1479 = vmatpush3.bf16.msra.mxu0 %v1771_v5 }
  0xec   :  { %1480 = vmatprep.subr.bf16.mxu0 %v1697_v0 }
  0xee   :  { %1465 = vmatpush3.bf16.msra.mxu1 %v1818_v13 }
  0xef   :  { %1466 = vmatprep.subr.bf16.mxu1 %v1697_v0  ;;  %1481 = vmatpush3.bf16.msra.mxu0 %v1778_v6 }
  0xf0   :  { %1492 = vmatprep.subr.bf16.mxu0 %v1697_v0 }
  0xf2   :  { %1467 = vmatpush3.bf16.msra.mxu1 %v1825_v14 }
  0xf3   :  { %1468 = vmatprep.subr.bf16.mxu1 %v1697_v0 }
  0xf6   :  { %1469 = vmatpush3.bf16.msra.mxu1 %v1832_v15 }
  0xf7   :  { %1486 = vmatprep.subr.bf16.mxu1 %v1697_v0 }
 0x1a1   :  { %v245_v30 = vpop.f32.mrf.mxu1  ;;  %v298_v31 = vpop.f32.mrf.mxu0 }
 0x1a2   :  { %v1878_v32 = vadd.f32 %v1875_v29, %v245_v30 }
 0x1a3   :  { %v1442_v33 = vpop.f32.mrf.mxu1  ;;  %v1454_v34 = vpop.f32.mrf.mxu0 }
 0x1a4   :  { %251 = vmax.xlane.f32.xlu0 %v1878_v32 }
 0x1a5   :  { %v248_v35 = vpop.f32.mrf.mxu1  ;;  %v301_v36 = vpop.f32.mrf.mxu0 }
 0x1a7   :  { %v1443_v37 = vpop.f32.mrf.mxu1  ;;  %v1455_v38 = vpop.f32.mrf.mxu0 }
 0x1a9   :  { %v341_v39 = vpop.f32.mrf.mxu1 }
 0x1aa   :  { %v342_v40 = vadd.f32 %v341_v39, %v298_v31 }
 0x1ab   :  { %v1460_v41 = vpop.f32.mrf.mxu1 }
 0x1ac   :  { %v347_v42 = vadd.f32 %v342_v40, %v1839_v20 }
 0x1ad   :  { %v344_v43 = vpop.f32.mrf.mxu1 }
 0x1ae   :  { %v348_v44 = vpack.c.bf16 %v347_v42, %v347_v42 }
 0x1af   :  { %v1461_v45 = vpop.f32.mrf.mxu1 }
 0x1b0   :  { %1471 = vmatmul.mubr.msk.bf16.vlgmr.msra.gmra.mxu1 %vm34_vm2, %v348_v44  ;;  %1483 = vmatmul.mubr.msk.bf16.vlgmr.msra.gmra.mxu0 %vm34_vm2, %v348_v44 }
 0x1b1   :  { %1487 = vmatpush3.bf16.msra.mxu1 %v1785_v9  ;;  %1488 = vmatprep.mubr.msk.bf16.mxu1 %vm1698_vm1, %v1697_v0 }
 0x1b2   :  { %1504 = vmatprep.subr.bf16.mxu1 %v1697_v0  ;;  %1493 = vmatpush3.bf16.msra.mxu0 %v1811_v12 }
 0x1b3   :  { %1494 = vmatprep.subr.bf16.mxu0 %v1697_v0  ;;  %1500 = vmatprep.mubr.msk.bf16.mxu0 %vm1698_vm1, %v1697_v0 }
 0x1b6   :  { %1495 = vmatpush3.bf16.msra.mxu0 %v1818_v13 }
 0x1b7   :  { %1496 = vmatprep.subr.bf16.mxu0 %v1697_v0 }
 0x1b8   :  { %1489 = vmatmul.mubr.msk.bf16.vlgmr.msra.gmra.mxu1 %vm132_vm3, %v1288_v46  ;;  %v1303_v46 = vld [vmem:[%s2119_s1 + $0x14] sm:$0xf] }
 0x1b9   :  { %1505 = vmatpush3.bf16.msra.mxu1 %v1754_v2  ;;  %1512 = vmatprep.mubr.msk.bf16.mxu1 %vm1698_vm1, %v1697_v0 }
 0x1ba   :  { %1506 = vmatprep.subr.bf16.mxu1 %v1697_v0  ;;  %1497 = vmatpush3.bf16.msra.mxu0 %v1825_v14 }
 0x1bb   :  { %1498 = vmatprep.subr.bf16.mxu0 %v1697_v0 }
 0x1bd   :  { %1507 = vmatpush3.bf16.msra.mxu1 %v1760_v3 }
 0x1be   :  { %1508 = vmatprep.subr.bf16.mxu1 %v1697_v0  ;;  %1499 = vmatpush3.bf16.msra.mxu0 %v1832_v15 }
 0x1bf   :  { %1516 = vmatprep.subr.bf16.mxu0 %v1697_v0 }
 0x1c1   :  { %1509 = vmatpush3.bf16.msra.mxu1 %v1771_v5 }
 0x1c2   :  { %1510 = vmatprep.subr.bf16.mxu1 %v1697_v0 }
 0x1c5   :  { %1511 = vmatpush3.bf16.msra.mxu1 %v1778_v6 }
 0x1c6   :  { %1522 = vmatprep.subr.bf16.mxu1 %v1697_v0 }
 0x270   :  { %v386_v47 = vpop.f32.mrf.mxu1  ;;  %v440_v48 = vpop.f32.mrf.mxu0 }
 0x271   :  { %v1913_v49 = vadd.f32 %v1875_v29, %v386_v47 }
 0x272   :  { %v1472_v50 = vpop.f32.mrf.mxu1  ;;  %v1484_v51 = vpop.f32.mrf.mxu0 }
 0x273   :  { %392 = vmax.xlane.f32.xlu0 %v1913_v49 }
 0x274   :  { %v389_v52 = vpop.f32.mrf.mxu1  ;;  %v443_v53 = vpop.f32.mrf.mxu0 }
 0x276   :  { %v1473_v54 = vpop.f32.mrf.mxu1  ;;  %v1485_v55 = vpop.f32.mrf.mxu0 }
 0x278   :  { %v483_v56 = vpop.f32.mrf.mxu1 }
 0x279   :  { %v484_v57 = vadd.f32 %v483_v56, %v440_v48 }
 0x27a   :  { %v1490_v58 = vpop.f32.mrf.mxu1 }
 0x27b   :  { %v489_v59 = vadd.f32 %v484_v57, %v1839_v20 }
 0x27c   :  { %v486_v60 = vpop.f32.mrf.mxu1 }
 0x27d   :  { %v490_v61 = vpack.c.bf16 %v489_v59, %v489_v59 }
 0x27e   :  { %v1491_v62 = vpop.f32.mrf.mxu1 }
 0x27f   :  { %1501 = vmatmul.mubr.msk.bf16.vlgmr.msra.gmra.mxu0 %vm34_vm2, %v490_v61  ;;  %1513 = vmatmul.mubr.msk.bf16.vlgmr.msra.gmra.mxu1 %vm34_vm2, %v490_v61 }
 0x280   :  { %1517 = vmatpush3.bf16.msra.mxu0 %v1785_v9  ;;  %1518 = vmatprep.mubr.msk.bf16.mxu0 %vm1698_vm1, %v1697_v0 }
 0x281   :  { %1534 = vmatprep.subr.bf16.mxu0 %v1697_v0  ;;  %1523 = vmatpush3.bf16.msra.mxu1 %v1811_v12 }
 0x282   :  { %1524 = vmatprep.subr.bf16.mxu1 %v1697_v0  ;;  %1530 = vmatprep.mubr.msk.bf16.mxu1 %vm1698_vm1, %v1697_v0 }
 0x285   :  { %1525 = vmatpush3.bf16.msra.mxu1 %v1818_v13 }
 0x286   :  { %1526 = vmatprep.subr.bf16.mxu1 %v1697_v0 }
 0x287   :  { %1519 = vmatmul.mubr.msk.bf16.vlgmr.msra.gmra.mxu0 %vm132_vm3, %v1293_v63 }
 0x288   :  { %1535 = vmatpush3.bf16.msra.mxu0 %v1754_v2  ;;  %1542 = vmatprep.mubr.msk.bf16.mxu0 %vm1698_vm1, %v1697_v0 }
 0x289   :  { %1536 = vmatprep.subr.bf16.mxu0 %v1697_v0  ;;  %1527 = vmatpush3.bf16.msra.mxu1 %v1825_v14 }
 0x28a   :  { %1528 = vmatprep.subr.bf16.mxu1 %v1697_v0 }
 0x28c   :  { %1537 = vmatpush3.bf16.msra.mxu0 %v1760_v3 }
 0x28d   :  { %1538 = vmatprep.subr.bf16.mxu0 %v1697_v0  ;;  %1529 = vmatpush3.bf16.msra.mxu1 %v1832_v15 }
 0x28e   :  { %1546 = vmatprep.subr.bf16.mxu1 %v1697_v0 }
 0x290   :  { %1539 = vmatpush3.bf16.msra.mxu0 %v1771_v5 }
 0x291   :  { %1540 = vmatprep.subr.bf16.mxu0 %v1697_v0 }
 0x294   :  { %1541 = vmatpush3.bf16.msra.mxu0 %v1778_v6 }
 0x295   :  { %1552 = vmatprep.subr.bf16.mxu0 %v1697_v0 }
 0x33f   :  { %v528_v1 = vpop.f32.mrf.mxu0  ;;  %v582_v4 = vpop.f32.mrf.mxu1 }
 0x340   :  { %v1948_v7 = vadd.f32 %v1875_v29, %v528_v1  ;;  %v1308_v1 = vld [vmem:[%s2119_s1 + $0x18] sm:$0xf] }
 0x341   :  { %v1502_v8 = vpop.f32.mrf.mxu0  ;;  %v1514_v10 = vpop.f32.mrf.mxu1 }
 0x342   :  { %534 = vmax.xlane.f32.xlu1 %v1948_v7 }
 0x343   :  { %v531_v11 = vpop.f32.mrf.mxu0  ;;  %v585_v16 = vpop.f32.mrf.mxu1 }
 0x345   :  { %v1503_v17 = vpop.f32.mrf.mxu0  ;;  %v1515_v18 = vpop.f32.mrf.mxu1 }
 0x347   :  { %v625_v19 = vpop.f32.mrf.mxu0 }
 0x348   :  { %v626_v21 = vadd.f32 %v625_v19, %v582_v4 }
 0x349   :  { %v1520_v22 = vpop.f32.mrf.mxu0 }
 0x34a   :  { %v631_v23 = vadd.f32 %v626_v21, %v1839_v20 }
 0x34b   :  { %v628_v24 = vpop.f32.mrf.mxu0 }
 0x34c   :  { %v632_v25 = vpack.c.bf16 %v631_v23, %v631_v23 }
 0x34d   :  { %v1521_v26 = vpop.f32.mrf.mxu0 }
 0x34e   :  { %1531 = vmatmul.mubr.msk.bf16.vlgmr.msra.gmra.mxu1 %vm34_vm2, %v632_v25  ;;  %1543 = vmatmul.mubr.msk.bf16.vlgmr.msra.gmra.mxu0 %vm34_vm2, %v632_v25  ;;  %v1313_v25 = vld [vmem:[%s2119_s1 + $0x1c] sm:$0xf] }
 0x34f   :  { %1547 = vmatpush3.bf16.msra.mxu1 %v1785_v9  ;;  %1548 = vmatprep.mubr.msk.bf16.mxu1 %vm1698_vm1, %v1697_v0 }
 0x350   :  { %1564 = vmatprep.subr.bf16.mxu1 %v1697_v0  ;;  %1553 = vmatpush3.bf16.msra.mxu0 %v1811_v12 }
 0x351   :  { %1554 = vmatprep.subr.bf16.mxu0 %v1697_v0  ;;  %1560 = vmatprep.mubr.msk.bf16.mxu0 %vm1698_vm1, %v1697_v0 }
 0x354   :  { %1555 = vmatpush3.bf16.msra.mxu0 %v1818_v13 }
 0x355   :  { %1556 = vmatprep.subr.bf16.mxu0 %v1697_v0 }
 0x356   :  { %1549 = vmatmul.mubr.msk.bf16.vlgmr.msra.gmra.mxu1 %vm132_vm3, %v1298_v27 }
 0x357   :  { %1565 = vmatpush3.bf16.msra.mxu1 %v1754_v2  ;;  %1572 = vmatprep.mubr.msk.bf16.mxu1 %vm1698_vm1, %v1697_v0 }
 0x358   :  { %1566 = vmatprep.subr.bf16.mxu1 %v1697_v0  ;;  %1557 = vmatpush3.bf16.msra.mxu0 %v1825_v14 }
 0x359   :  { %1558 = vmatprep.subr.bf16.mxu0 %v1697_v0 }
 0x35b   :  { %1567 = vmatpush3.bf16.msra.mxu1 %v1760_v3 }
 0x35c   :  { %1568 = vmatprep.subr.bf16.mxu1 %v1697_v0  ;;  %1559 = vmatpush3.bf16.msra.mxu0 %v1832_v15 }
 0x35d   :  { %1576 = vmatprep.subr.bf16.mxu0 %v1697_v0 }
 0x35f   :  { %1569 = vmatpush3.bf16.msra.mxu1 %v1771_v5 }
 0x360   :  { %1570 = vmatprep.subr.bf16.mxu1 %v1697_v0 }
 0x363   :  { %1571 = vmatpush3.bf16.msra.mxu1 %v1778_v6 }
 0x364   :  { %1582 = vmatprep.subr.bf16.mxu1 %v1697_v0 }
 0x3cb   :  { %v535_v27 = vpop.xlane.xlu1 %534 }
 0x40e   :  { %v670_v28 = vpop.f32.mrf.mxu1  ;;  %v724_v30 = vpop.f32.mrf.mxu0 }
 0x40f   :  { %v1983_v31 = vadd.f32 %v1875_v29, %v670_v28 }
 0x410   :  { %v1532_v33 = vpop.f32.mrf.mxu1  ;;  %v1544_v34 = vpop.f32.mrf.mxu0 }
 0x411   :  { %676 = vmax.xlane.f32.xlu1 %v1983_v31 }
 0x412   :  { %v673_v35 = vpop.f32.mrf.mxu1  ;;  %v727_v36 = vpop.f32.mrf.mxu0 }
 0x414   :  { %v1533_v37 = vpop.f32.mrf.mxu1  ;;  %v1545_v38 = vpop.f32.mrf.mxu0 }
 0x416   :  { %v767_v39 = vpop.f32.mrf.mxu1 }
 0x417   :  { %v768_v40 = vadd.f32 %v767_v39, %v724_v30  ;;  %v536_v30 = vsub.f32 %v1948_v7, %v535_v27 }
 0x418   :  { %v1550_v41 = vpop.f32.mrf.mxu1 }
 0x419   :  { %v773_v42 = vadd.f32 %v768_v40, %v1839_v20  ;;  %v537_v33 = vmul.f32 1.442695, %v536_v30 }
 0x41a   :  { %v770_v43 = vpop.f32.mrf.mxu1 }
 0x41b   :  { %v774_v44 = vpack.c.bf16 %v773_v42, %v773_v42 }
 0x41c   :  { %v1551_v45 = vpop.f32.mrf.mxu1 }
 0x41d   :  { %1561 = vmatmul.mubr.msk.bf16.vlgmr.msra.gmra.mxu0 %vm34_vm2, %v774_v44  ;;  %1573 = vmatmul.mubr.msk.bf16.vlgmr.msra.gmra.mxu1 %vm34_vm2, %v774_v44 }
 0x41e   :  { %1577 = vmatpush3.bf16.msra.mxu0 %v1785_v9  ;;  %1578 = vmatprep.mubr.msk.bf16.mxu0 %vm1698_vm1, %v1697_v0 }
 0x41f   :  { %1594 = vmatprep.subr.bf16.mxu0 %v1697_v0  ;;  %1583 = vmatpush3.bf16.msra.mxu1 %v1811_v12 }
 0x420   :  { %1584 = vmatprep.subr.bf16.mxu1 %v1697_v0  ;;  %1590 = vmatprep.mubr.msk.bf16.mxu1 %vm1698_vm1, %v1697_v0 }
 0x423   :  { %1585 = vmatpush3.bf16.msra.mxu1 %v1818_v13 }
 0x424   :  { %1586 = vmatprep.subr.bf16.mxu1 %v1697_v0 }
 0x425   :  { %1579 = vmatmul.mubr.msk.bf16.vlgmr.msra.gmra.mxu0 %vm132_vm3, %v1303_v46 }
 0x426   :  { %1595 = vmatpush3.bf16.msra.mxu0 %v1754_v2  ;;  %1602 = vmatprep.mubr.msk.bf16.mxu0 %vm1698_vm1, %v1697_v0 }
 0x427   :  { %1596 = vmatprep.subr.bf16.mxu0 %v1697_v0  ;;  %1587 = vmatpush3.bf16.msra.mxu1 %v1825_v14 }
 0x428   :  { %1588 = vmatprep.subr.bf16.mxu1 %v1697_v0 }
 0x42a   :  { %1597 = vmatpush3.bf16.msra.mxu0 %v1760_v3 }
 0x42b   :  { %1598 = vmatprep.subr.bf16.mxu0 %v1697_v0  ;;  %1589 = vmatpush3.bf16.msra.mxu1 %v1832_v15 }
 0x42c   :  { %1606 = vmatprep.subr.bf16.mxu1 %v1697_v0 }
 0x42e   :  { %1599 = vmatpush3.bf16.msra.mxu0 %v1771_v5 }
 0x42f   :  { %1600 = vmatprep.subr.bf16.mxu0 %v1697_v0 }
 0x432   :  { %1601 = vmatpush3.bf16.msra.mxu0 %v1778_v6 }
 0x433   :  { %1612 = vmatprep.subr.bf16.mxu0 %v1697_v0 }
 0x4dd   :  { %v812_v47 = vpop.f32.mrf.mxu0  ;;  %v866_v48 = vpop.f32.mrf.mxu1 }
 0x4de   :  { %v2018_v50 = vadd.f32 %v1875_v29, %v812_v47 }
 0x4df   :  { %v1562_v51 = vpop.f32.mrf.mxu0  ;;  %v1574_v52 = vpop.f32.mrf.mxu1 }
 0x4e0   :  { %818 = vmax.xlane.f32.xlu0 %v2018_v50 }
 0x4e1   :  { %v815_v53 = vpop.f32.mrf.mxu0  ;;  %v869_v54 = vpop.f32.mrf.mxu1 }
 0x4e3   :  { %v1563_v55 = vpop.f32.mrf.mxu0  ;;  %v1575_v56 = vpop.f32.mrf.mxu1 }
 0x4e5   :  { %v909_v57 = vpop.f32.mrf.mxu0 }
 0x4e6   :  { %v910_v58 = vadd.f32 %v909_v57, %v866_v48 }
 0x4e7   :  { %v1580_v59 = vpop.f32.mrf.mxu0 }
 0x4e8   :  { %v915_v60 = vadd.f32 %v910_v58, %v1839_v20 }
 0x4e9   :  { %v912_v61 = vpop.f32.mrf.mxu0 }
 0x4ea   :  { %v916_v62 = vpack.c.bf16 %v915_v60, %v915_v60 }
 0x4eb   :  { %v1581_v63 = vpop.f32.mrf.mxu0 }
 0x4ec   :  { %1591 = vmatmul.mubr.msk.bf16.vlgmr.msra.gmra.mxu1 %vm34_vm2, %v916_v62  ;;  %1603 = vmatmul.mubr.msk.bf16.vlgmr.msra.gmra.mxu0 %vm34_vm2, %v916_v62 }
 0x4ed   :  { %1607 = vmatpush3.bf16.msra.mxu1 %v1785_v9  ;;  %1608 = vmatprep.mubr.msk.bf16.mxu1 %vm1698_vm1, %v1697_v0 }
 0x4ee   :  { %1624 = vmatprep.subr.bf16.mxu1 %v1697_v0  ;;  %1613 = vmatpush3.bf16.msra.mxu0 %v1811_v12 }
 0x4ef   :  { %1614 = vmatprep.subr.bf16.mxu0 %v1697_v0  ;;  %1620 = vmatprep.mubr.msk.bf16.mxu0 %vm1698_vm1, %v1697_v0 }
 0x4f2   :  { %1615 = vmatpush3.bf16.msra.mxu0 %v1818_v13 }
 0x4f3   :  { %1616 = vmatprep.subr.bf16.mxu0 %v1697_v0 }
 0x4f4   :  { %1609 = vmatmul.mubr.msk.bf16.vlgmr.msra.gmra.mxu1 %vm132_vm3, %v1308_v1 }
 0x4f5   :  { %1625 = vmatpush3.bf16.msra.mxu1 %v1754_v2  ;;  %1632 = vmatprep.mubr.msk.bf16.mxu1 %vm1698_vm1, %v1697_v0 }
 0x4f6   :  { %1626 = vmatprep.subr.bf16.mxu1 %v1697_v0  ;;  %1617 = vmatpush3.bf16.msra.mxu0 %v1825_v14 }
 0x4f7   :  { %1618 = vmatprep.subr.bf16.mxu0 %v1697_v0 }
 0x4f9   :  { %1627 = vmatpush3.bf16.msra.mxu1 %v1760_v3 }
 0x4fa   :  { %1628 = vmatprep.subr.bf16.mxu1 %v1697_v0  ;;  %1619 = vmatpush3.bf16.msra.mxu0 %v1832_v15 }
 0x4fb   :  { %1636 = vmatprep.subr.bf16.mxu0 %v1697_v0 }
 0x4fd   :  { %1629 = vmatpush3.bf16.msra.mxu1 %v1771_v5 }
 0x4fe   :  { %1630 = vmatprep.subr.bf16.mxu1 %v1697_v0 }
 0x501   :  { %1631 = vmatpush3.bf16.msra.mxu1 %v1778_v6 }
 0x502   :  { %1642 = vmatprep.subr.bf16.mxu1 %v1697_v0 }
 0x5ac   :  { %v954_v2 = vpop.f32.mrf.mxu1  ;;  %v1008_v4 = vpop.f32.mrf.mxu0 }
 0x5ad   :  { %v2053_v8 = vadd.f32 %v1875_v29, %v954_v2 }
 0x5ae   :  { %v1592_v3 = vpop.f32.mrf.mxu1  ;;  %v1604_v10 = vpop.f32.mrf.mxu0 }
 0x5af   :  { %960 = vmax.xlane.f32.xlu1 %v2053_v8  ;;  %v677_v3 = vpop.xlane.xlu1 %676 }
 0x5b0   :  { %v957_v11 = vpop.f32.mrf.mxu1  ;;  %v1011_v16 = vpop.f32.mrf.mxu0 }
 0x5b1   :  { %v678_v11 = vsub.f32 %v1983_v31, %v677_v3 }
 0x5b2   :  { %v1593_v17 = vpop.f32.mrf.mxu1  ;;  %v1605_v18 = vpop.f32.mrf.mxu0 }
 0x5b3   :  { %v679_v17 = vmul.f32 1.442695, %v678_v11 }
 0x5b4   :  { %v1051_v5 = vpop.f32.mrf.mxu1 }
 0x5b5   :  { %v1052_v19 = vadd.f32 %v1051_v5, %v1008_v4 }
 0x5b6   :  { %v1610_v21 = vpop.f32.mrf.mxu1 }
 0x5b7   :  { %v1057_v6 = vadd.f32 %v1052_v19, %v1839_v20 }
 0x5b8   :  { %v1054_v22 = vpop.f32.mrf.mxu1 }
 0x5b9   :  { %v1058_v23 = vpack.c.bf16 %v1057_v6, %v1057_v6 }
 0x5ba   :  { %v1611_v24 = vpop.f32.mrf.mxu1 }
 0x5bb   :  { %1621 = vmatmul.mubr.msk.bf16.vlgmr.msra.gmra.mxu0 %vm34_vm2, %v1058_v23  ;;  %1633 = vmatmul.mubr.msk.bf16.vlgmr.msra.gmra.mxu1 %vm34_vm2, %v1058_v23 }
 0x5bc   :  { %1637 = vmatpush3.bf16.msra.mxu0 %v1785_v9  ;;  %1638 = vmatprep.mubr.msk.bf16.mxu0 %vm1698_vm1, %v1697_v0  ;;  %v252_v9 = vpop.xlane.xlu0 %251 }
 0x5bd   :  { %1643 = vmatpush3.bf16.msra.mxu1 %v1811_v12  ;;  %1650 = vmatprep.mubr.msk.bf16.mxu1 %vm1698_vm1, %v1697_v0  ;;  %v253_v12 = vsub.f32 %v1878_v32, %v252_v9 }
 0x5be   :  { %1644 = vmatprep.subr.bf16.mxu1 %v1697_v0 }
 0x5bf   :  { %v254_v28 = vmul.f32 1.442695, %v253_v12 }
 0x5c0   :  { %v2076_v26 = vpop.xlane.xlu0 %392 }
 0x5c1   :  { %1645 = vmatpush3.bf16.msra.mxu1 %v1818_v13  ;;  %1665 = vpow2.f32 %v254_v28  ;;  %v394_v4 = vsub.f32 %v1913_v49, %v2076_v26 }
 0x5c2   :  { %1646 = vmatprep.subr.bf16.mxu1 %v1697_v0  ;;  %1667 = vpow2.f32 %v537_v33 }
 0x5c3   :  { %1639 = vmatmul.mubr.msk.bf16.vlgmr.msra.gmra.mxu0 %vm132_vm3, %v1313_v25  ;;  %v395_v10 = vmul.f32 1.442695, %v394_v4 }
 0x5c4   :  { %v819_v13 = vpop.xlane.xlu0 %818 }
 0x5c5   :  { %1647 = vmatpush3.bf16.msra.mxu1 %v1825_v14  ;;  %v820_v34 = vsub.f32 %v2018_v50, %v819_v13 }
 0x5c6   :  { %1648 = vmatprep.subr.bf16.mxu1 %v1697_v0 }
 0x5c7   :  { %v821_v14 = vmul.f32 1.442695, %v820_v34 }
 0x5c9   :  { %1649 = vmatpush3.bf16.msra.mxu1 %v1832_v15  ;;  %1669 = vpow2.f32 %v821_v14 }
 0x5ce   :  { %v1666_v39 = vpop.eup %1665 }
 0x5cf   :  { %v1668_v43 = vpop.eup %1667 }
 0x5d6   :  { %v1670_v48 = vpop.eup %1669 }
 0x638   :  { %v961_v16 = vpop.xlane.xlu1 %960 }
 0x639   :  { %v962_v18 = vsub.f32 %v2053_v8, %v961_v16 }
 0x63b   :  { %v963_v5 = vmul.f32 1.442695, %v962_v18 }
 0x67b   :  { %v1096_v35 = vpop.f32.mrf.mxu0  ;;  %v1150_v0 = vpop.f32.mrf.mxu1 }
 0x67c   :  { %v1097_v15 = vadd.f32 %v1875_v29, %v1096_v35 }
 0x67d   :  { %v1622_v36 = vpop.f32.mrf.mxu0  ;;  %v1634_v32 = vpop.f32.mrf.mxu1 }
 0x67e   :  { %1102 = vmax.xlane.f32.xlu0 %v1097_v15 }
 0x67f   :  { %v1099_v37 = vpop.f32.mrf.mxu0  ;;  %v1153_v38 = vpop.f32.mrf.mxu1 }
 0x681   :  { %v1623_v40 = vpop.f32.mrf.mxu0  ;;  %v1635_v7 = vpop.f32.mrf.mxu1 }
 0x682   :  { %256 = vadd.xlane.f32.xlu0 %v1666_v39 }
 0x683   :  { %v1193_v41 = vpop.f32.mrf.mxu0 }
 0x684   :  { %v1194_v42 = vadd.f32 %v1193_v41, %v1150_v0 }
 0x685   :  { %v1640_v44 = vpop.f32.mrf.mxu0 }
 0x686   :  { %v1199_v45 = vadd.f32 %v1194_v42, %v1839_v20  ;;  %539 = vadd.xlane.f32.xlu0 %v1668_v43 }
 0x687   :  { %v1196_v46 = vpop.f32.mrf.mxu0 }
 0x688   :  { %v1200_v47 = vpack.c.bf16 %v1199_v45, %v1199_v45  ;;  %1256 = vst.msk [vmem:[#allocation2] sm:$0xff] %vm34_vm2, %v1199_v45 }
 0x689   :  { %1261 = vst.msk [vmem:[%s2123_s8] sm:$0xff] %vm1260_vm4, %v1199_v45  ;;  %v1641_v50 = vpop.f32.mrf.mxu0 }
 0x68a   :  { %823 = vadd.xlane.f32.xlu0 %v1670_v48  ;;  %1651 = vmatmul.mubr.msk.bf16.vlgmr.msra.gmra.mxu1 %vm34_vm2, %v1200_v47 }
 0x707   :  { %v1103_v51 = vpop.xlane.xlu0 %1102 }
 0x708   :  { %v1104_v52 = vsub.f32 %v1097_v15, %v1103_v51 }
 0x70a   :  { %v1105_v53 = vmul.f32 1.442695, %v1104_v52 }
 0x70b   :  { %v257_v54 = vpop.xlane.xlu0 %256 }
 0x70c   :  { %1671 = vpow2.f32 %v1105_v53 }
 0x70d   :  { %1673 = vlog2.f32 %v257_v54 }
 0x70f   :  { %v540_v20 = vpop.xlane.xlu0 %539 }
 0x710   :  { %1675 = vlog2.f32 %v540_v20 }
 0x713   :  { %v824_v55 = vpop.xlane.xlu0 %823 }
 0x714   :  { %1677 = vlog2.f32 %v824_v55 }
 0x715   :  { %1679 = vpow2.f32 %v395_v10 }
 0x716   :  { %1681 = vpow2.f32 %v679_v17 }
 0x717   :  { %1683 = vpow2.f32 %v963_v5 }
 0x719   :  { %v1672_v56 = vpop.eup %1671 }
 0x71a   :  { %v1674_v57 = vpop.eup %1673  ;;  %1107 = vadd.xlane.f32.xlu0 %v1672_v56 }
 0x71b   :  { %v259_v58 = vmul.f32 0.6931472, %v1674_v57 }
 0x71d   :  { %v1676_v59 = vpop.eup %1675  ;;  %v260_v60 = vsub.f32 %v253_v12, %v259_v58 }
 0x71e   :  { %v542_v61 = vmul.f32 0.6931472, %v1676_v59 }
 0x71f   :  { %261 = vst [vmem:[%s2124_s7] sm:$0xff] %v260_v60 }
 0x720   :  { %v543_v62 = vsub.f32 %v536_v30, %v542_v61 }
 0x721   :  { %v1678_v63 = vpop.eup %1677 }
 0x722   :  { %1292 = vst [vmem:[%s2124_s7 + $0x10] sm:$0xff] %v543_v62  ;;  %v826_v1 = vmul.f32 0.6931472, %v1678_v63  ;;  %v1680_v23 = vpop.eup %1679 }
 0x723   :  { %v1682_v24 = vpop.eup %1681 }
 0x724   :  { %v827_v2 = vsub.f32 %v820_v34, %v826_v1  ;;  %v1684_v31 = vpop.eup %1683 }
 0x726   :  { %1302 = vst [vmem:[%s2124_s7 + $0x20] sm:$0xff] %v827_v2 }
 0x74a   :  { %v1238_v19 = vpop.f32.mrf.mxu1 }
 0x74b   :  { %v1239_v21 = vadd.f32 %v1875_v29, %v1238_v19 }
 0x74c   :  { %v1652_v6 = vpop.f32.mrf.mxu1 }
 0x74d   :  { %1244 = vmax.xlane.f32.xlu1 %v1239_v21 }
 0x74e   :  { %v1241_v22 = vpop.f32.mrf.mxu1 }
 0x750   :  { %v1653_v49 = vpop.f32.mrf.mxu1 }
 0x751   :  { %397 = vadd.xlane.f32.xlu1 %v1680_v23 }
 0x755   :  { %681 = vadd.xlane.f32.xlu1 %v1682_v24 }
 0x759   :  { %965 = vadd.xlane.f32.xlu1 %v1684_v31 }
 0x7a3   :  { %v1108_v25 = vpop.xlane.xlu0 %1107 }
 0x7a4   :  { %1685 = vlog2.f32 %v1108_v25 }
 0x7b1   :  { %v1686_v9 = vpop.eup %1685 }
 0x7b2   :  { %v1110_v8 = vmul.f32 0.6931472, %v1686_v9 }
 0x7b4   :  { %v1111_v12 = vsub.f32 %v1104_v52, %v1110_v8 }
 0x7b6   :  { %1312 = vst [vmem:[%s2124_s7 + $0x30] sm:$0xff] %v1111_v12 }
 0x7d6   :  { %v1245_v29 = vpop.xlane.xlu1 %1244 }
 0x7d7   :  { %v1246_v26 = vsub.f32 %v1239_v21, %v1245_v29 }
 0x7d9   :  { %v1247_v27 = vmul.f32 1.442695, %v1246_v26 }
 0x7da   :  { %v398_v28 = vpop.xlane.xlu1 %397 }
 0x7db   :  { %1687 = vpow2.f32 %v1247_v27 }
 0x7dc   :  { %1689 = vlog2.f32 %v398_v28 }
 0x7de   :  { %v682_v30 = vpop.xlane.xlu1 %681 }
 0x7df   :  { %1691 = vlog2.f32 %v682_v30 }
 0x7e2   :  { %v966_v13 = vpop.xlane.xlu1 %965 }
 0x7e3   :  { %1693 = vlog2.f32 %v966_v13 }
 0x7e8   :  { %v1688_v33 = vpop.eup %1687 }
 0x7e9   :  { %v1690_v34 = vpop.eup %1689  ;;  %1249 = vadd.xlane.f32.xlu1 %v1688_v33 }
 0x7ea   :  { %v400_v14 = vmul.f32 0.6931472, %v1690_v34 }
 0x7ec   :  { %v1692_v35 = vpop.eup %1691  ;;  %v401_v0 = vsub.f32 %v394_v4, %v400_v14 }
 0x7ed   :  { %v684_v15 = vmul.f32 0.6931472, %v1692_v35 }
 0x7ee   :  { %1287 = vst [vmem:[%s2124_s7 + $0x8] sm:$0xff] %v401_v0 }
 0x7ef   :  { %v685_v36 = vsub.f32 %v678_v11, %v684_v15 }
 0x7f0   :  { %v1694_v32 = vpop.eup %1693 }
 0x7f1   :  { %1297 = vst [vmem:[%s2124_s7 + $0x18] sm:$0xff] %v685_v36  ;;  %v968_v37 = vmul.f32 0.6931472, %v1694_v32 }
 0x7f3   :  { %v969_v38 = vsub.f32 %v962_v18, %v968_v37 }
 0x7f5   :  { %1307 = vst [vmem:[%s2124_s7 + $0x28] sm:$0xff] %v969_v38 }
 0x872   :  { %v1250_v39 = vpop.xlane.xlu1 %1249 }
 0x873   :  { %1695 = vlog2.f32 %v1250_v39 }
 0x880   :  { %v1696_v40 = vpop.eup %1695 }
 0x881   :  { %v1252_v7 = vmul.f32 0.6931472, %v1696_v40 }
 0x883   :  { %v1253_v41 = vsub.f32 %v1246_v26, %v1252_v7 }
 0x885   :  { %1317 = vst [vmem:[%s2124_s7 + $0x38] sm:$0xff] %v1253_v41 }

</bundles_post_ra>
